<compile_context>
chip_gen: v6e
topology: v6e:2x2x1
jax: 0.10.0
libtpu: 0.0.40
codegen_flags: <defaults>
</compile_context>

<pallas_src>
import numpy as np
import jax
import jax.numpy as jnp
from jax import lax
from jax.experimental import pallas as pl
from jax.experimental.pallas import tpu as pltpu


# --------------------------------------------------------------------------- #
# Helpers
# --------------------------------------------------------------------------- #
def _vmem_capacity_bytes():
    try:
        return int(pltpu.get_tpu_info().vmem_capacity_bytes)
    except Exception:
        return 64 * 1024 * 1024  # conservative fallback (v7x per-TC)


def _choose_flat_tile(hw, c, itemsize, vmem_budget_bytes):
    """Pick a lane-dense tile of the flattened H*W axis that fits VMEM."""
    if hw % 128 != 0:
        # Fall back to the full-extent block (always legal: equals array dim).
        return hw
    cands = [d for d in range(128, hw + 1, 128) if hw % d == 0]
    # ~3 scan streams (in, src, out) double-buffered + label/coord streams.
    def tile_bytes(t):
        return (6 * c + 10) * t * itemsize
    fitting = [t for t in cands if tile_bytes(t) <= vmem_budget_bytes]
    return max(fitting) if fitting else min(cands)


def _round_up(x, m):
    return ((x + m - 1) // m) * m


# --------------------------------------------------------------------------- #
# Kernel 1: dense bbox mixing of range_scan and pred_label (lane-dense layout)
# --------------------------------------------------------------------------- #
def _bbox_mix_kernel(urand_ref, bbh1_ref, bbh2_ref, bbw1_ref, bbw2_ref,
                     hids_ref, wids_ref,
                     scan_ref, scan_src_ref, label_ref, label_src_ref,
                     out_scan_ref, out_label_ref):
    b = pl.program_id(0)
    K = bbh1_ref.shape[1]

    h_ids = hids_ref[...]            # (1, FT) int32, precomputed in wrapper
    w_ids = wids_ref[...]            # (1, FT) int32

    inside = jnp.zeros(h_ids.shape, dtype=jnp.bool_)
    for k in range(K):
        h1 = bbh1_ref[b, k]
        h2 = bbh2_ref[b, k]
        w1 = bbw1_ref[b, k]
        w2 = bbw2_ref[b, k]
        inside = inside | ((h_ids >= h1) & (h_ids < h2) &
                           (w_ids >= w1) & (w_ids < w2))

    inside3 = inside[:, None, :]     # (1, 1, FT) broadcast over C
    out_scan_ref[...] = jnp.where(inside3, scan_src_ref[...], scan_ref[...])
    out_label_ref[...] = jnp.where(inside3, label_src_ref[...], label_ref[...])


# --------------------------------------------------------------------------- #
# Kernel 2: per-point keep / cut classification (sublane/lane-full layout)
# --------------------------------------------------------------------------- #
def _point_mask_kernel(urand_ref, bbh1_ref, bbh2_ref, bbw1_ref, bbw2_ref,
                       pb_ref, pw_ref, ph_ref,
                       keep_ref, cut_ref):
    B, K = bbh1_ref.shape
    pb = pb_ref[...]
    pw = pw_ref[...]
    ph = ph_ref[...]

    mix_hit = jnp.zeros(pb.shape, dtype=jnp.bool_)
    cut_hit = jnp.zeros(pb.shape, dtype=jnp.bool_)

    for idx in range(B):
        inside = jnp.zeros(pb.shape, dtype=jnp.bool_)
        for k in range(K):
            h1 = bbh1_ref[idx, k]
            h2 = bbh2_ref[idx, k]
            w1 = bbw1_ref[idx, k]
            w2 = bbw2_ref[idx, k]
            inside = inside | ((ph >= h1) & (ph < h2) &
                               (pw >= w1) & (pw < w2))
        cond_mix = pb == idx                     # point belongs to target batch
        cond_org = pb == urand_ref[idx]          # point belongs to source batch
        mix_hit = mix_hit | (cond_mix & inside)
        cut_hit = cut_hit | (cond_org & inside)

    # NOTE: keep = NOT(mix_hit) is only equivalent to the reference
    # XOR(cond_mix, mix_any) because the host glue ANDs it with (pb == idx).
    # Do not use keep_mask standalone.
    keep_ref[...] = jnp.logical_not(mix_hit).astype(jnp.int8)
    cut_ref[...] = cut_hit.astype(jnp.int8)


# --------------------------------------------------------------------------- #
# Wrapper
# --------------------------------------------------------------------------- #
def range_mix_pallas(range_scan, project_coord, range_embed, pred_label,
                     u_rand_index, bbw1, bbw2, bbh1, bbh2):
    B, C, H, W = range_scan.shape
    HW = H * W
    N = project_coord.shape[0]

    urand = u_rand_index.astype(jnp.int32)
    bbh1 = bbh1.astype(jnp.int32)
    bbh2 = bbh2.astype(jnp.int32)
    bbw1 = bbw1.astype(jnp.int32)
    bbw2 = bbw2.astype(jnp.int32)

    # Per-generation VMEM-aware tile choice for the flattened spatial axis.
    vmem_cap = _vmem_capacity_bytes()
    vmem_limit = min(int(vmem_cap * 0.7), 112 * 1024 * 1024)
    scan_itemsize = jnp.dtype(range_scan.dtype).itemsize
    FT = _choose_flat_tile(HW, C, scan_itemsize, int(vmem_limit * 0.5))
    T = HW // FT

    # Lane-dense flattened layouts.
    scan_flat = range_scan.reshape(B, C, HW)
    label_flat = pred_label.reshape(B, 1, HW)
    flat = jnp.arange(HW, dtype=jnp.int32)
    h_ids = (flat // W).reshape(1, HW)
    w_ids = (flat % W).reshape(1, HW)

    # ---- dense bbox mixing --------------------------------------------------
    mix_scan_flat, mix_label_flat = pl.pallas_call(
        _bbox_mix_kernel,
        out_shape=(jax.ShapeDtypeStruct((B, C, HW), range_scan.dtype),
                   jax.ShapeDtypeStruct((B, 1, HW), pred_label.dtype)),
        grid_spec=pltpu.PrefetchScalarGridSpec(
            num_scalar_prefetch=5,
            grid=(B, T),
            in_specs=[
                pl.BlockSpec((1, FT), lambda b, t, ur, *_: (0, t)),      # h_ids
                pl.BlockSpec((1, FT), lambda b, t, ur, *_: (0, t)),      # w_ids
                pl.BlockSpec((1, C, FT), lambda b, t, ur, *_: (b, 0, t)),       # scan
                pl.BlockSpec((1, C, FT), lambda b, t, ur, *_: (ur[b], 0, t)),   # scan src
                pl.BlockSpec((1, 1, FT), lambda b, t, ur, *_: (b, 0, t)),       # label
                pl.BlockSpec((1, 1, FT), lambda b, t, ur, *_: (ur[b], 0, t)),   # label src
            ],
            out_specs=[
                pl.BlockSpec((1, C, FT), lambda b, t, ur, *_: (b, 0, t)),
                pl.BlockSpec((1, 1, FT), lambda b, t, ur, *_: (b, 0, t)),
            ]),
        compiler_params=pltpu.CompilerParams(
            dimension_semantics=("parallel", "parallel"),
            vmem_limit_bytes=vmem_limit),
    )(urand, bbh1, bbh2, bbw1, bbw2,
      h_ids, w_ids, scan_flat, scan_flat, label_flat, label_flat)

    mix_scan = mix_scan_flat.reshape(B, C, H, W)
    mix_label = mix_label_flat.reshape(B, H, W)

    # ---- per-point classification (sublane/lane-full layout) ----------------
    R = -(-N // 128)                         # rows of 128 lanes
    if R <= 256:
        TR = _round_up(max(R, 1), 32)        # 32-row aligned (int8-safe)
        R_pad = TR
    else:
        TR = 256
        R_pad = _round_up(R, TR)
    N_pad = R_pad * 128
    pad = N_pad - N

    pb = jnp.pad(project_coord[:, 0].astype(jnp.int32), (0, pad),
                 constant_values=-1).reshape(R_pad, 128)
    pw = jnp.pad(project_coord[:, 1].astype(jnp.int32), (0, pad),
                 constant_values=-1).reshape(R_pad, 128)
    ph = jnp.pad(project_coord[:, 2].astype(jnp.int32), (0, pad),
                 constant_values=-1).reshape(R_pad, 128)

    keep2, cut2 = pl.pallas_call(
        _point_mask_kernel,
        out_shape=(jax.ShapeDtypeStruct((R_pad, 128), jnp.int8),
                   jax.ShapeDtypeStruct((R_pad, 128), jnp.int8)),
        grid_spec=pltpu.PrefetchScalarGridSpec(
            num_scalar_prefetch=5,
            grid=(R_pad // TR,),
            in_specs=[pl.BlockSpec((TR, 128), lambda t, *_: (t, 0))] * 3,
            out_specs=[pl.BlockSpec((TR, 128), lambda t, *_: (t, 0))] * 2),
        compiler_params=pltpu.CompilerParams(
            dimension_semantics=("parallel",)),
    )(urand, bbh1, bbh2, bbw1, bbw2, pb, pw, ph)

    keep = keep2.reshape(-1)[:N]
    cut = cut2.reshape(-1)[:N]
    return mix_scan, mix_label, keep, cut


# --------------------------------------------------------------------------- #
# Host-side glue: dynamic-shape compaction (exact PyTorch ordering).
# TODO(synk): boolean-mask gather has data-dependent output shapes; no static
#             Pallas/TPU equivalent, so the final compaction is host-side numpy.
# --------------------------------------------------------------------------- #
def compact_points(project_coord, range_embed, u_rand_index,
                   keep_mask, cut_mask):
    pc = np.asarray(project_coord)
    pe = np.asarray(range_embed)
    urand = np.asarray(u_rand_index)
    keep = np.asarray(keep_mask).astype(bool)
    cut = np.asarray(cut_mask).astype(bool)
    pb = pc[:, 0]
    B = urand.shape[0]

    mix_pc, mix_emb = [], []
    for idx in range(B):
        mix_sel = (pb == idx) & keep
        cut_sel = (pb == urand[idx]) & cut
        inst_mix = pc[mix_sel]
        inst_cut = pc[cut_sel].copy()
        inst_cut[:, 0] = idx
        mix_pc.append(np.concatenate([inst_mix, inst_cut], axis=0))
        mix_emb.append(np.concatenate([pe[mix_sel], pe[cut_sel]], axis=0))
    return np.concatenate(mix_pc, axis=0), np.concatenate(mix_emb, axis=0)


# --------------------------------------------------------------------------- #
# numpy reference (mirrors the PyTorch forward exactly) for self-check
# --------------------------------------------------------------------------- #
def reference_forward(range_scan, project_coord, range_embed, pred_label,
                      u_rand_index, bbw1, bbw2, bbh1, bbh2):
    rs = np.asarray(range_scan)
    pc = np.asarray(project_coord)
    pe = np.asarray(range_embed)
    pl_ = np.asarray(pred_label)
    urand = np.asarray(u_rand_index)
    bbw1, bbw2 = np.asarray(bbw1), np.asarray(bbw2)
    bbh1, bbh2 = np.asarray(bbh1), np.asarray(bbh2)
    B = rs.shape[0]
    K = bbw1.shape[1]

    mix_scan = rs.copy()
    mix_label = pl_.copy()
    mix_pc, mix_emb = [], []
    for idx in range(B):
        cond_mix = pc[:, 0] == idx
        cond_org = pc[:, 0] == urand[idx]
        inst_mix_m, inst_cut_m = [], []
        for k in range(K):
            h1, h2 = bbh1[idx, k], bbh2[idx, k]
            w1, w2 = bbw1[idx, k], bbw2[idx, k]
            mix_scan[idx, :, h1:h2, w1:w2] = rs[urand[idx], :, h1:h2, w1:w2]
            mix_label[idx, h1:h2, w1:w2] = pl_[urand[idx], h1:h2, w1:w2]
            cond_h = (pc[:, 2] >= h1) & (pc[:, 2] < h2)
            cond_w = (pc[:, 1] >= w1) & (pc[:, 1] < w2)
            box = cond_h & cond_w
            inst_mix_m.append(cond_mix & box)
            inst_cut_m.append(cond_org & box)
        mix_any = np.any(np.stack(inst_mix_m), axis=0)
        cut_any = np.any(np.stack(inst_cut_m), axis=0)
        keep = np.logical_xor(cond_mix, mix_any)
        inst_mix = pc[keep]
        inst_cut = pc[cut_any].copy()
        inst_cut[:, 0] = idx
        mix_pc.append(np.concatenate([inst_mix, inst_cut], axis=0))
        mix_emb.append(np.concatenate([pe[keep], pe[cut_any]], axis=0))
    return (mix_scan, np.concatenate(mix_pc, 0), mix_label,
            np.concatenate(mix_emb, 0))


# --------------------------------------------------------------------------- #
if __name__ == "__main__":
    B, C, H, W = 2, 4, 16, 16
    N, D = 256, 32
    range_mix_factor = 3        # K
    K = range_mix_factor

    key = jax.random.PRNGKey(0)
    keys = jax.random.split(key, 10)

    range_scan = jax.random.normal(keys[0], (B, C, H, W), dtype=jnp.float32)
    pred_label = jax.random.randint(keys[1], (B, H, W), 0, 20, dtype=jnp.int32)
    # project_coord rows: [batch, w, h, extra]
    pc_b = jax.random.randint(keys[2], (N, 1), 0, B, dtype=jnp.int32)
    pc_w = jax.random.randint(keys[3], (N, 1), 0, W, dtype=jnp.int32)
    pc_h = jax.random.randint(keys[4], (N, 1), 0, H, dtype=jnp.int32)
    pc_e = jax.random.randint(keys[5], (N, 1), 0, 100, dtype=jnp.int32)
    project_coord = jnp.concatenate([pc_b, pc_w, pc_h, pc_e], axis=1)
    range_embed = jax.random.normal(keys[6], (N, D), dtype=jnp.float32)

    # randomness of the forward pass (deterministic here)
    u_rand_index = jax.random.permutation(keys[7], jnp.arange(B, dtype=jnp.int32))
    lam = float(jax.random.beta(keys[8], 4.0, 4.0))
    bbx_w = jnp.cumsum(
        jax.random.randint(keys[9], (B, K + 1), 0, W // (K + 1), dtype=jnp.int32),
        axis=1)
    bbw1, bbw2 = bbx_w[:, :K], bbx_w[:, 1:]
    cut_h = int(H * np.sqrt(1.0 - lam))
    kk = jax.random.split(keys[9], 2)[1]
    bbx_h = jax.random.randint(kk, (B, K + 1), H // 8, H, dtype=jnp.int32)
    bbh1 = jnp.clip(bbx_h - cut_h // 2, 0, H)[:, :K]
    bbh2 = jnp.clip(bbx_h + cut_h // 2, 0, H)[:, :K]

    # ---- run Pallas kernels -------------------------------------------------
    mix_scan, mix_label, keep_mask, cut_mask = range_mix_pallas(
        range_scan, project_coord, range_embed, pred_label,
        u_rand_index, bbw1, bbw2, bbh1, bbh2)
    jax.block_until_ready((mix_scan, mix_label, keep_mask, cut_mask))

    mix_project_coord, mix_range_embed = compact_points(
        project_coord, range_embed, u_rand_index, keep_mask, cut_mask)

    # ---- verify against numpy reference ------------------------------------
    ref_scan, ref_pc, ref_label, ref_emb = reference_forward(
        range_scan, project_coord, range_embed, pred_label,
        u_rand_index, bbw1, bbw2, bbh1, bbh2)

    assert np.allclose(np.asarray(mix_scan), ref_scan)
    assert np.array_equal(np.asarray(mix_label), ref_label)
    assert np.array_equal(mix_project_coord, ref_pc)
    assert np.allclose(mix_range_embed, ref_emb)

    print("KERNEL_OK")
</pallas_src>

<mosaic_0001>
module attributes {stable_mosaic.version = 11 : i64} {
  func.func @_bbox_mix_kernel(%arg0: i32, %arg1: i32, %arg2: memref<2xi32, #tpu.memory_space<smem>>, %arg3: memref<2x3xi32, #tpu.memory_space<smem>>, %arg4: memref<2x3xi32, #tpu.memory_space<smem>>, %arg5: memref<2x3xi32, #tpu.memory_space<smem>>, %arg6: memref<2x3xi32, #tpu.memory_space<smem>>, %arg7: memref<1x256xi32, #tpu.memory_space<vmem>>, %arg8: memref<1x256xi32, #tpu.memory_space<vmem>>, %arg9: memref<1x4x256xf32, #tpu.memory_space<vmem>>, %arg10: memref<1x4x256xf32, #tpu.memory_space<vmem>>, %arg11: memref<1x1x256xi32, #tpu.memory_space<vmem>>, %arg12: memref<1x1x256xi32, #tpu.memory_space<vmem>>, %arg13: memref<1x4x256xf32, #tpu.memory_space<vmem>>, %arg14: memref<1x1x256xi32, #tpu.memory_space<vmem>>) attributes {dimension_semantics = [#tpu.dimension_semantics<parallel>, #tpu.dimension_semantics<parallel>], iteration_bounds = array<i64: 2, 1>, scalar_prefetch = 5 : i64, scratch_operands = 0 : i64, tpu.core_type = #tpu.core_type<tc>, window_params = [{transform_indices = @transform_0, window_bounds = array<i64: 1, 256>}, {transform_indices = @transform_1, window_bounds = array<i64: 1, 256>}, {transform_indices = @transform_2, window_bounds = array<i64: 1, 4, 256>}, {transform_indices = @transform_3, window_bounds = array<i64: 1, 4, 256>}, {transform_indices = @transform_4, window_bounds = array<i64: 1, 1, 256>}, {transform_indices = @transform_5, window_bounds = array<i64: 1, 1, 256>}, {transform_indices = @transform_6, window_bounds = array<i64: 1, 4, 256>}, {transform_indices = @transform_7, window_bounds = array<i64: 1, 1, 256>}]} {
    %c0 = arith.constant 0 : index
    %c0_0 = arith.constant 0 : index
    %0 = vector.load %arg7[%c0, %c0_0] : memref<1x256xi32, #tpu.memory_space<vmem>>, vector<1x256xi32>
    %c0_1 = arith.constant 0 : index
    %c0_2 = arith.constant 0 : index
    %1 = vector.load %arg8[%c0_1, %c0_2] : memref<1x256xi32, #tpu.memory_space<vmem>>, vector<1x256xi32>
    %false = arith.constant false
    %2 = vector.broadcast %false : i1 to vector<1x256xi1>
    %3 = arith.index_cast %arg0 : i32 to index
    %c0_3 = arith.constant 0 : index
    %4 = memref.load %arg3[%3, %c0_3] : memref<2x3xi32, #tpu.memory_space<smem>>
    %5 = arith.index_cast %arg0 : i32 to index
    %c0_4 = arith.constant 0 : index
    %6 = memref.load %arg4[%5, %c0_4] : memref<2x3xi32, #tpu.memory_space<smem>>
    %7 = arith.index_cast %arg0 : i32 to index
    %c0_5 = arith.constant 0 : index
    %8 = memref.load %arg5[%7, %c0_5] : memref<2x3xi32, #tpu.memory_space<smem>>
    %9 = arith.index_cast %arg0 : i32 to index
    %c0_6 = arith.constant 0 : index
    %10 = memref.load %arg6[%9, %c0_6] : memref<2x3xi32, #tpu.memory_space<smem>>
    %11 = vector.broadcast %4 : i32 to vector<1x256xi32>
    %12 = arith.cmpi sge, %0, %11 : vector<1x256xi32>
    %13 = vector.broadcast %6 : i32 to vector<1x256xi32>
    %14 = arith.cmpi slt, %0, %13 : vector<1x256xi32>
    %15 = arith.andi %12, %14 : vector<1x256xi1>
    %16 = vector.broadcast %8 : i32 to vector<1x256xi32>
    %17 = arith.cmpi sge, %1, %16 : vector<1x256xi32>
    %18 = arith.andi %15, %17 : vector<1x256xi1>
    %19 = vector.broadcast %10 : i32 to vector<1x256xi32>
    %20 = arith.cmpi slt, %1, %19 : vector<1x256xi32>
    %21 = arith.andi %18, %20 : vector<1x256xi1>
    %22 = arith.ori %2, %21 : vector<1x256xi1>
    %23 = arith.index_cast %arg0 : i32 to index
    %c1 = arith.constant 1 : index
    %24 = memref.load %arg3[%23, %c1] : memref<2x3xi32, #tpu.memory_space<smem>>
    %25 = arith.index_cast %arg0 : i32 to index
    %c1_7 = arith.constant 1 : index
    %26 = memref.load %arg4[%25, %c1_7] : memref<2x3xi32, #tpu.memory_space<smem>>
    %27 = arith.index_cast %arg0 : i32 to index
    %c1_8 = arith.constant 1 : index
    %28 = memref.load %arg5[%27, %c1_8] : memref<2x3xi32, #tpu.memory_space<smem>>
    %29 = arith.index_cast %arg0 : i32 to index
    %c1_9 = arith.constant 1 : index
    %30 = memref.load %arg6[%29, %c1_9] : memref<2x3xi32, #tpu.memory_space<smem>>
    %31 = vector.broadcast %24 : i32 to vector<1x256xi32>
    %32 = arith.cmpi sge, %0, %31 : vector<1x256xi32>
    %33 = vector.broadcast %26 : i32 to vector<1x256xi32>
    %34 = arith.cmpi slt, %0, %33 : vector<1x256xi32>
    %35 = arith.andi %32, %34 : vector<1x256xi1>
    %36 = vector.broadcast %28 : i32 to vector<1x256xi32>
    %37 = arith.cmpi sge, %1, %36 : vector<1x256xi32>
    %38 = arith.andi %35, %37 : vector<1x256xi1>
    %39 = vector.broadcast %30 : i32 to vector<1x256xi32>
    %40 = arith.cmpi slt, %1, %39 : vector<1x256xi32>
    %41 = arith.andi %38, %40 : vector<1x256xi1>
    %42 = arith.ori %22, %41 : vector<1x256xi1>
    %43 = arith.index_cast %arg0 : i32 to index
    %c2 = arith.constant 2 : index
    %44 = memref.load %arg3[%43, %c2] : memref<2x3xi32, #tpu.memory_space<smem>>
    %45 = arith.index_cast %arg0 : i32 to index
    %c2_10 = arith.constant 2 : index
    %46 = memref.load %arg4[%45, %c2_10] : memref<2x3xi32, #tpu.memory_space<smem>>
    %47 = arith.index_cast %arg0 : i32 to index
    %c2_11 = arith.constant 2 : index
    %48 = memref.load %arg5[%47, %c2_11] : memref<2x3xi32, #tpu.memory_space<smem>>
    %49 = arith.index_cast %arg0 : i32 to index
    %c2_12 = arith.constant 2 : index
    %50 = memref.load %arg6[%49, %c2_12] : memref<2x3xi32, #tpu.memory_space<smem>>
    %51 = vector.broadcast %44 : i32 to vector<1x256xi32>
    %52 = arith.cmpi sge, %0, %51 : vector<1x256xi32>
    %53 = vector.broadcast %46 : i32 to vector<1x256xi32>
    %54 = arith.cmpi slt, %0, %53 : vector<1x256xi32>
    %55 = arith.andi %52, %54 : vector<1x256xi1>
    %56 = vector.broadcast %48 : i32 to vector<1x256xi32>
    %57 = arith.cmpi sge, %1, %56 : vector<1x256xi32>
    %58 = arith.andi %55, %57 : vector<1x256xi1>
    %59 = vector.broadcast %50 : i32 to vector<1x256xi32>
    %60 = arith.cmpi slt, %1, %59 : vector<1x256xi32>
    %61 = arith.andi %58, %60 : vector<1x256xi1>
    %62 = arith.ori %42, %61 : vector<1x256xi1>
    %63 = vector.shape_cast %62 : vector<1x256xi1> to vector<1x1x256xi1>
    %c0_13 = arith.constant 0 : index
    %c0_14 = arith.constant 0 : index
    %c0_15 = arith.constant 0 : index
    %64 = vector.load %arg10[%c0_13, %c0_14, %c0_15] : memref<1x4x256xf32, #tpu.memory_space<vmem>>, vector<1x4x256xf32>
    %c0_16 = arith.constant 0 : index
    %c0_17 = arith.constant 0 : index
    %c0_18 = arith.constant 0 : index
    %65 = vector.load %arg9[%c0_16, %c0_17, %c0_18] : memref<1x4x256xf32, #tpu.memory_space<vmem>>, vector<1x4x256xf32>
    %66 = vector.shape_cast %63 : vector<1x1x256xi1> to vector<1x1x256xi1>
    %67 = vector.broadcast %66 : vector<1x1x256xi1> to vector<1x4x256xi1>
    %68 = arith.select %67, %64, %65 : vector<1x4x256xi1>, vector<1x4x256xf32>
    %c0_19 = arith.constant 0 : index
    %c0_20 = arith.constant 0 : index
    %c0_21 = arith.constant 0 : index
    %69 = vector.load %arg13[%c0_19, %c0_20, %c0_21] : memref<1x4x256xf32, #tpu.memory_space<vmem>>, vector<1x4x256xf32>
    tpu.vector_store %arg13[%c0_19, %c0_20, %c0_21], %68 {strides = array<i32>} : memref<1x4x256xf32, #tpu.memory_space<vmem>>, vector<1x4x256xf32>,
    %c0_22 = arith.constant 0 : index
    %c0_23 = arith.constant 0 : index
    %c0_24 = arith.constant 0 : index
    %70 = vector.load %arg12[%c0_22, %c0_23, %c0_24] : memref<1x1x256xi32, #tpu.memory_space<vmem>>, vector<1x1x256xi32>
    %c0_25 = arith.constant 0 : index
    %c0_26 = arith.constant 0 : index
    %c0_27 = arith.constant 0 : index
    %71 = vector.load %arg11[%c0_25, %c0_26, %c0_27] : memref<1x1x256xi32, #tpu.memory_space<vmem>>, vector<1x1x256xi32>
    %72 = arith.select %63, %70, %71 : vector<1x1x256xi1>, vector<1x1x256xi32>
    %c0_28 = arith.constant 0 : index
    %c0_29 = arith.constant 0 : index
    %c0_30 = arith.constant 0 : index
    %73 = vector.load %arg14[%c0_28, %c0_29, %c0_30] : memref<1x1x256xi32, #tpu.memory_space<vmem>>, vector<1x1x256xi32>
    tpu.vector_store %arg14[%c0_28, %c0_29, %c0_30], %72 {strides = array<i32>} : memref<1x1x256xi32, #tpu.memory_space<vmem>>, vector<1x1x256xi32>,
    return
  }
  func.func @transform_0(%arg0: i32, %arg1: i32, %arg2: memref<2xi32, #tpu.memory_space<smem>>, %arg3: memref<2x3xi32, #tpu.memory_space<smem>>, %arg4: memref<2x3xi32, #tpu.memory_space<smem>>, %arg5: memref<2x3xi32, #tpu.memory_space<smem>>, %arg6: memref<2x3xi32, #tpu.memory_space<smem>>) -> (i32, i32) {
    %c0_i32 = arith.constant 0 : i32
    %c0_i32_0 = arith.constant 0 : i32
    return %c0_i32, %arg1 : i32, i32
  }
  func.func @transform_1(%arg0: i32, %arg1: i32, %arg2: memref<2xi32, #tpu.memory_space<smem>>, %arg3: memref<2x3xi32, #tpu.memory_space<smem>>, %arg4: memref<2x3xi32, #tpu.memory_space<smem>>, %arg5: memref<2x3xi32, #tpu.memory_space<smem>>, %arg6: memref<2x3xi32, #tpu.memory_space<smem>>) -> (i32, i32) {
    %c0_i32 = arith.constant 0 : i32
    %c0_i32_0 = arith.constant 0 : i32
    return %c0_i32, %arg1 : i32, i32
  }
  func.func @transform_2(%arg0: i32, %arg1: i32, %arg2: memref<2xi32, #tpu.memory_space<smem>>, %arg3: memref<2x3xi32, #tpu.memory_space<smem>>, %arg4: memref<2x3xi32, #tpu.memory_space<smem>>, %arg5: memref<2x3xi32, #tpu.memory_space<smem>>, %arg6: memref<2x3xi32, #tpu.memory_space<smem>>) -> (i32, i32, i32) {
    %c0_i32 = arith.constant 0 : i32
    %c0_i32_0 = arith.constant 0 : i32
    return %arg0, %c0_i32, %arg1 : i32, i32, i32
  }
  func.func @transform_3(%arg0: i32, %arg1: i32, %arg2: memref<2xi32, #tpu.memory_space<smem>>, %arg3: memref<2x3xi32, #tpu.memory_space<smem>>, %arg4: memref<2x3xi32, #tpu.memory_space<smem>>, %arg5: memref<2x3xi32, #tpu.memory_space<smem>>, %arg6: memref<2x3xi32, #tpu.memory_space<smem>>) -> (i32, i32, i32) {
    %0 = arith.index_cast %arg0 : i32 to index
    %1 = memref.load %arg2[%0] : memref<2xi32, #tpu.memory_space<smem>>
    %c0_i32 = arith.constant 0 : i32
    %c0_i32_0 = arith.constant 0 : i32
    return %1, %c0_i32, %arg1 : i32, i32, i32
  }
  func.func @transform_4(%arg0: i32, %arg1: i32, %arg2: memref<2xi32, #tpu.memory_space<smem>>, %arg3: memref<2x3xi32, #tpu.memory_space<smem>>, %arg4: memref<2x3xi32, #tpu.memory_space<smem>>, %arg5: memref<2x3xi32, #tpu.memory_space<smem>>, %arg6: memref<2x3xi32, #tpu.memory_space<smem>>) -> (i32, i32, i32) {
    %c0_i32 = arith.constant 0 : i32
    %c0_i32_0 = arith.constant 0 : i32
    return %arg0, %c0_i32, %arg1 : i32, i32, i32
  }
  func.func @transform_5(%arg0: i32, %arg1: i32, %arg2: memref<2xi32, #tpu.memory_space<smem>>, %arg3: memref<2x3xi32, #tpu.memory_space<smem>>, %arg4: memref<2x3xi32, #tpu.memory_space<smem>>, %arg5: memref<2x3xi32, #tpu.memory_space<smem>>, %arg6: memref<2x3xi32, #tpu.memory_space<smem>>) -> (i32, i32, i32) {
    %0 = arith.index_cast %arg0 : i32 to index
    %1 = memref.load %arg2[%0] : memref<2xi32, #tpu.memory_space<smem>>
    %c0_i32 = arith.constant 0 : i32
    %c0_i32_0 = arith.constant 0 : i32
    return %1, %c0_i32, %arg1 : i32, i32, i32
  }
  func.func @transform_6(%arg0: i32, %arg1: i32, %arg2: memref<2xi32, #tpu.memory_space<smem>>, %arg3: memref<2x3xi32, #tpu.memory_space<smem>>, %arg4: memref<2x3xi32, #tpu.memory_space<smem>>, %arg5: memref<2x3xi32, #tpu.memory_space<smem>>, %arg6: memref<2x3xi32, #tpu.memory_space<smem>>) -> (i32, i32, i32) {
    %c0_i32 = arith.constant 0 : i32
    %c0_i32_0 = arith.constant 0 : i32
    return %arg0, %c0_i32, %arg1 : i32, i32, i32
  }
  func.func @transform_7(%arg0: i32, %arg1: i32, %arg2: memref<2xi32, #tpu.memory_space<smem>>, %arg3: memref<2x3xi32, #tpu.memory_space<smem>>, %arg4: memref<2x3xi32, #tpu.memory_space<smem>>, %arg5: memref<2x3xi32, #tpu.memory_space<smem>>, %arg6: memref<2x3xi32, #tpu.memory_space<smem>>) -> (i32, i32, i32) {
    %c0_i32 = arith.constant 0 : i32
    %c0_i32_0 = arith.constant 0 : i32
    return %arg0, %c0_i32, %arg1 : i32, i32, i32
  }
}

</mosaic_0001>

<bundles_post_ra>
// kernel: tpu_custom_call.1
= control target key start
LH: loop header
LB: loop body
LE: loop exit
PB: predicated region body
PF: predicated region fallthrough
CT: control target
= control target key end

     0   :  { %s1246_s21 = smov [#allocation3]   ;;  %s1247_s24 = smov [#allocation4]   ;;  %s1719_s0 = inlined_call_operand.hbm [shape: s32[2], index: 0, kind: input, shape index: {}]   ;;  %s1720_s5 = inlined_call_operand.hbm [shape: s32[1,256], index: 5, kind: input, shape index: {}]   ;;  %s1721_s6 = inlined_call_operand.vmem [shape: s32[1,256], index: 6, kind: input, shape index: {}]   ;;  %s1722_s7 = inlined_call_operand.hbm [shape: f32[2,4,256], index: 7, kind: input, shape index: {}]   ;;  %s1723_s8 = inlined_call_operand.hbm [shape: f32[2,4,256], index: 8, kind: input, shape index: {}]   ;;  %s1724_s9 = inlined_call_operand.vmem [shape: s32[2,1,256], index: 9, kind: input, shape index: {}]   ;;  %s1725_s10 = inlined_call_operand.vmem [shape: s32[2,1,256], index: 10, kind: input, shape index: {}]   ;;  %s1726_s11 = inlined_call_operand.hbm [shape: f32[2,4,256], index: 11, kind: output, shape index: {0}]   ;;  %s1727_s12 = inlined_call_operand.hbm [shape: s32[2,1,256], index: 12, kind: output, shape index: {1}]   ;;  %s1728_s1 = inlined_call_operand.hbm [shape: s32[2,3], index: 1, kind: input, shape index: {}]   ;;  %s1729_s2 = inlined_call_operand.hbm [shape: s32[2,3], index: 2, kind: input, shape index: {}]   ;;  %s1730_s3 = inlined_call_operand.hbm [shape: s32[2,3], index: 3, kind: input, shape index: {}]   ;;  %s1731_s4 = inlined_call_operand.hbm [shape: s32[2,3], index: 4, kind: input, shape index: {}]  }
   0x1   :  { %1747 = sst [smem:[#allocation32_spill]] %s1720_s5  ;;  %s1248_s27 = smov [#allocation5]  }
   0x2   :  { %1748 = sst [smem:[#allocation33_spill]] %s1722_s7  ;;  %s1249_s30 = smov [#allocation6]  }
   0x3   :  { %1749 = sst [smem:[#allocation34_spill]] %s1726_s11  ;;  %s1250_s15 = smov [#allocation7]  }
   0x4   :  { %1750 = sst [smem:[#allocation35_spill]] %s1727_s12 }
   0x5   :  { %19 = dma.hbm_to_smem %s1719_s0, 16, %s1246_s21, [#allocation2] }
   0x6   :  { %21 = dma.hbm_to_smem %s1728_s1, 32, %s1247_s24, [#allocation2] }
   0x7   :  { %23 = dma.hbm_to_smem %s1729_s2, 32, %s1248_s27, [#allocation2] }
   0x8   :  { %25 = dma.hbm_to_smem %s1730_s3, 32, %s1249_s30, [#allocation2] }
   0x9   :  { %27 = dma.hbm_to_smem %s1731_s4, 32, %s1250_s15, [#allocation2] }
   0xa   :  { %1188 = dma.done.wait [#allocation2], 144 }
   0xb   :  { %1189 = vsyncadd [#allocation2], 4294967152 }
   0xc   :  { %29 = sfence }
   0xd   :  { %30 = vsyncpa [#allocation9], 0 }
   0xe   :  { %31 = vsyncpa [#allocation12], 0 }
   0xf   :  { %33 = vsyncpa [#allocation12 + $0x1], 0 }
  0x10   :  { %34 = vsyncpa [#allocation10], 0 }
  0x11   :  { %36 = vsyncpa [#allocation10 + $0x1], 0 }
  0x12   :  { %37 = vsyncpa [#allocation16], 0 }
  0x13   :  { %39 = vsyncpa [#allocation16 + $0x1], 0  ;;  %s1337_s0 = smov 0   ;;  %s1339_s1 = smov 0  }
  0x14   :  { %s1341_s2 = smov 0   ;;  %s1343_s3 = smov 0  }
  0x15   :  { %s1345_s18 = smov 0   ;;  %s1347_s4 = smov 0  }
  0x16   :  { %s1349_s19 = smov 0   ;;  %s1351_s20 = smov 0  }
  0x17   :  { %s1353_s21 = smov 0  }
  0x18 LB: > { %1751 = sst [smem:[#allocation25_spill]] %s1220_s2  ;;  %s57_s22 = sadd.s32 1, %s1240_s20  ;;  %s1244_s21 = sphi %s1353_s21, %s45_s21   ;;  %s1240_s20 = sphi %s1351_s20, %s1798_s20   ;;  %s1236_s19 = sphi %s1349_s19, %s1797_s19   ;;  %s1232_s4 = sphi %s1347_s4, %s1796_s4   ;;  %s1228_s18 = sphi %s1345_s18, %s1802_s18   ;;  %s1224_s3 = sphi %s1343_s3, %s1801_s3   ;;  %s1220_s2 = sphi %s1341_s2, %s1794_s2   ;;  %s1216_s1 = sphi %s1339_s1, %s1800_s1   ;;  %s1212_s0 = sphi %s1337_s0, %s1799_s0  }
  0x19   : > { %1752 = sst [smem:[#allocation26_spill]] %s1232_s4  ;;  %s118_s23 = sadd.s32 1, %s1232_s4 }
  0x1a   : > { %1753 = sst [smem:[#allocation27_spill]] %s1240_s20  ;;  %p59_p0 = scmp.ge.s32.totalorder %s57_s22, 2 }
  0x1b   : > { %1754 = sst [smem:[#allocation28_spill]] %s1244_s21  ;;  %p125_p1 = scmp.ne.s32.totalorder %s1232_s4, %s1228_s18 }
  0x1c   : > { %p1736_p2 = scmp.eq.s32.totalorder %s1244_s21, 0  ;;  %s1388_s24 = sld [smem:[#allocation3 + %s1240_s20]] }
  0x1d   : > { %s1804_s22 = smov (%p59_p0, %s57_s22), 0  ;;  %p1735_p6 = scmp.lt.s32.totalorder %s1244_s21, 2 }
  0x1e   : > { %1755 = sst [smem:[#allocation29_spill]] %s1804_s22  ;;  %p1397_p3 = por %p1736_p2, %p125_p1 }
  0x1f   : > { %s113_s26 = ssub.s32 %s1240_s20, %s1804_s22  ;;  %s1405_s27 = sld [smem:[#allocation3 + %s1804_s22]] }
  0x20   : > { %p116_p5 = scmp.eq.s32.totalorder %s113_s26, 0  ;;  %s321_s28 = sand.u32 1, %s1244_s21  }
  0x21   : > { %s323_s29 = sand.u32 1, %s1232_s4   ;;  %s855_s14 = sshll.u32 %s1240_s20, 7 }
  0x22   : > { %s1411_s30 = scalar_select %p116_p5, %s1232_s4, %s118_s23  }
  0x23   : > { %s832_s13 = sshll.u32 %s323_s29, 3  ;;  %s1758_s7 = sld [smem:[#allocation33_spill]] }
  0x24   : > { %1757 = sst [smem:[#allocation30_spill]] %s1411_s30  ;;  %s325_s11 = scalar_lea.vmem [#allocation11], %s832_s13 }
  0x25   : > { %s335_s12 = sshll.u32 %s325_s11, 4  ;;  %p1421_p7 = pnand %p1735_p6, %p1397_p3  ;;  %s336_s12 = int_to_ptr.vmem [resolvable:$true] %s335_s12 }
  0x26   : > { %s1425_s26 = scalar_lea.sflag [#allocation12], %s321_s28  ;;  %s1031_s23 = scalar_lea.vmem %s336_s12, 128 }
  0x27   : > { %p1020_p8 = pneg %p1421_p7  ;;  %p1032_p9 = scmp.ne.s32.totalorder %s336_s12, %s1031_s23 }
  0x28   : > { %s1251_s29 = smov [#allocation11]  }
  0x29   : > { %s333_s17 = scalar_lea.hbm %s1758_s7, %s855_s14  ;;  %p1034_p10 = pnand %p1032_p9, %p1020_p8 }
  0x2a   : > { %s1036_s14 = sshll.u32 %s1251_s29, 4  ;;  %s1037_s14 = int_to_ptr.vmem [resolvable:$false] %s1036_s14 }
  0x2b   : > { %p1035_p11 = pneg %p1034_p10  ;;  %s1038_s11 = scalar_lea.vmem %s1037_s14, 256 }
  0x2c   : > { %p1039_p12 = scmp.lt.s32.totalorder %s336_s12, %s1037_s14  ;;  %p1040_p13 = scmp.lt.s32.totalorder %s1038_s11, %s1031_s23 }
  0x2e   : > { %p1041_p0 = por %p1040_p13, %p1039_p12 }
  0x30   : > { %p1042_p3 = pnand %p1041_p0, %p1035_p11 }
  0x32   : > { %1045 = shalt.err (!%p1042_p3)
}
  0x33   : > { %880 = dma.hbm_to_vmem [thread:$0]  (!%p1421_p7), %s333_s17, 128, %s336_s12, %s1425_s26  }
  0x34   : > { %s1433_s25 = sadd.s32 4294967295, %s1244_s21   ;;  %s827_s28 = sadd.s32 4294967294, %s1244_s21  }
  0x35   : > { %p131_p5 = scmp.ne.s32.totalorder %s1228_s18, %s1224_s3  ;;  %p1738_p8 = scmp.eq.s32.totalorder %s1433_s25, 0 }
  0x36   : > { %p161_p9 = scmp.ne.s32.totalorder %s1216_s1, %s1212_s0  ;;  %p245_p10 = scmp.eq.s32.totalorder %s1433_s25, 1 }
  0x37   : > { %p251_p11 = scmp.eq.s32.totalorder %s827_s28, 1  ;;  %p1444_p7 = por %p1738_p8, %p131_p5 }
  0x38   : > { %p1450_p12 = por %p161_p9, %p1738_p8  ;;  %p1457_p13 = por %p245_p10, %p125_p1 }
  0x39   : > { %s1760_s12 = scalar_select %p1444_p7, 1, 0 }
  0x3a   : > { %s1761_s22 = scalar_select %p1450_p12, 1, 0 }
  0x3b   : > { %s1762_s13 = scalar_select %p1457_p13, 1, 0 }
  0x3c   : > { %p1461_p0 = por %p251_p11, %p131_p5  ;;  %p828_p3 = scmp.ge.s32.totalorder %s1244_s21, 1 }
  0x3d   : > { %p286_p4 = scmp.lt.s32.totalorder %s1244_s21, 3  ;;  %s1252_s16 = smov [#allocation8]  }
  0x3e   : > { %s1763_s0 = scalar_select %p1461_p0, 1, 0 }
  0x3f   : > { %p1467_p6 = pnand %p828_p3, %p286_p4  ;;  %s302_s17 = sshll.u32 %s1252_s16, 4  ;;  %s303_s17 = int_to_ptr.vmem [resolvable:$true] %s302_s17 }
  0x40   : > { %s143_s23 = ssub.s32 %s1388_s24, %s1405_s27  ;;  %s148_s11 = sadd.s32 1, %s1220_s2 }
  0x41   : > { %s1764_s15 = scalar_select %p1467_p6, 1, 0 }
  0x42   : > { %p873_p9 = pneg %p1467_p6  ;;  %p1481_p5 = scmp.eq.s32.totalorder %s143_s23, 0 }
  0x43   : > { %p155_p4 = scmp.ne.s32.totalorder %s1220_s2, %s1216_s1  ;;  %s344_s28 = sand.u32 1, %s1220_s2  }
  0x44   : > { %p1477_p1 = pnand %p873_p9, %p1738_p8  ;;  %s1057_s16 = scalar_lea.vmem %s303_s17, 32 }
  0x45   : > { %p1058_p11 = scmp.ne.s32.totalorder %s303_s17, %s1057_s16  ;;  %p1065_p0 = scmp.lt.s32.totalorder %s303_s17, %s303_s17 }
  0x46   : > { %p1048_p10 = pneg %p1477_p1  ;;  %p1066_p13 = scmp.lt.s32.totalorder %s1057_s16, %s1057_s16 }
  0x48   : > { %p1060_p3 = pnand %p1058_p11, %p1048_p10  ;;  %p1067_p9 = por %p1066_p13, %p1065_p0 }
  0x4a   : > { %p1061_p2 = pneg %p1060_p3 }
  0x4c   : > { %p1068_p8 = pnand %p1067_p9, %p1061_p2 }
  0x4e   : > { %1071 = shalt.err (!%p1068_p8)
}
  0x4f   : > { %s1767_s5 = sld [smem:[#allocation32_spill]]  ;;  %p1769_p2 = scmp.eq.s32.totalorder %s1244_s21, 0 }
  0x50   : > { %s1499_s23 = scalar_select %p1481_p5, %s1220_s2, %s148_s11  }
  0x51   : > { %p157_p8 = por %p155_p4, %p1769_p2  ;;  %s835_s29 = sshll.u32 %s344_s28, 3 }
  0x52   : > { %1768 = sst [smem:[#allocation31_spill]] %s1499_s23  ;;  %p1770_p13 = scmp.lt.s32.totalorder %s1244_s21, 2 }
  0x53   : > { %s862_s16 = scalar_select %p157_p8, [#allocation3], [#allocation17] }
  0x54   : > { %s863_s7 = scalar_select %p157_p8, %s1240_s20, 0 }
  0x55   : > { %876 = dma.hbm_to_vmem [thread:$0]  (!%p1477_p1), %s1767_s5, 32, %s303_s17, [#allocation9]  }
  0x56   : > { %s1806_s16 = smov (!%p1770_p13, %s862_s16), [#allocation18]  ;;  %p1771_p0 = pmov %p1770_p13 }
  0x57   : > { %s346_s14 = scalar_lea.vmem [#allocation13], %s835_s29  ;;  %s1077_s2 = scalar_lea.hbm %s1723_s8, 256 }
  0x58   : > { %s1808_s7 = smov (!%p1771_p0, %s863_s7), 0  ;;  %p1772_p10 = pmov %p1771_p0 }
  0x59   : > { %s347_s17 = sld [smem:[%s1806_s16 + %s1808_s7]]  ;;  %s357_s11 = sshll.u32 %s346_s14, 4  ;;  %s358_s11 = int_to_ptr.vmem [resolvable:$true] %s357_s11 }
  0x5a   : > { %p1513_p11 = pnand %p1772_p10, %p157_p8 }
  0x5c   : > { %p1074_p5 = pneg %p1513_p11 }
  0x5f   : > { %s856_s27 = sshll.u32 %s347_s17, 7 }
  0x60   : > { %s355_s28 = scalar_lea.hbm %s1723_s8, %s856_s27 }
  0x61   : > { %s1072_s20 = scalar_lea.hbm %s355_s28, 128  ;;  %p1078_p9 = scmp.lt.s32.totalorder %s355_s28, %s1723_s8 }
  0x62   : > { %p1073_p1 = scmp.ne.s32.totalorder %s355_s28, %s1072_s20  ;;  %p1079_p2 = scmp.lt.s32.totalorder %s1077_s2, %s1072_s20 }
  0x64   : > { %p1075_p4 = pnand %p1074_p5, %p1073_p1  ;;  %p1080_p8 = por %p1079_p2, %p1078_p9 }
  0x66   : > { %p1076_p3 = pneg %p1075_p4 }
  0x68   : > { %p1081_p13 = pnand %p1080_p8, %p1076_p3 }
  0x6a   : > { %1084 = shalt.err (!%p1081_p13)
}
  0x6b   : > { %s1085_s5 = scalar_lea.vmem %s358_s11, 128  ;;  %s1253_s30 = smov [#allocation13]  }
  0x6c   : > { %p1086_p0 = scmp.ne.s32.totalorder %s358_s11, %s1085_s5  ;;  %s1090_s29 = sshll.u32 %s1253_s30, 4  ;;  %s1091_s29 = int_to_ptr.vmem [resolvable:$false] %s1090_s29 }
  0x6d   : > { %s1092_s16 = scalar_lea.vmem %s1091_s29, 256  ;;  %p1093_p1 = scmp.lt.s32.totalorder %s358_s11, %s1091_s29 }
  0x6e   : > { %p1088_p10 = pnand %p1086_p0, %p1074_p5  ;;  %p1094_p4 = scmp.lt.s32.totalorder %s1092_s16, %s1085_s5 }
  0x70   : > { %p1089_p12 = pneg %p1088_p10  ;;  %p1095_p7 = por %p1094_p4, %p1093_p1 }
  0x72   : > { %p1096_p6 = pnand %p1095_p7, %p1089_p12 }
  0x74   : > { %1099 = shalt.err (!%p1096_p6)
}
  0x75   : > { %885 = dma.hbm_to_vmem [thread:$0]  (!%p1513_p11), %s355_s28, 128, %s358_s11, %s1425_s26  }
  0x76   : > { %p1774_p3 = scmp.ne.s32.totalorder %s1764_s15, 0 }
  0x77   : > { %p1775_p9 = scmp.eq.s32.totalorder (!%p1774_p3), %s1433_s25, 0 }
  0x78   : > { %392 = sbr.rel (%p1774_p3) target bundleno = 202 (0xca), region = 44 }
  0x7d   : > { %1191 = dma.done.wait (%p1775_p9), [#allocation9], 32   ;;  %p1776_p5 = pmov %p1775_p9 }
  0x7e   : > { %s398_s2 = sand.u32 1, %s1433_s25   ;;  %s1539_s4 = sand.u32 1, %s1228_s18  }
  0x7f   : > { %1193 = vsyncadd (%p1776_p5), [#allocation9], 4294967264  ;;  %s840_s20 = sshll.u32 %s1539_s4, 3  ;;  %s399_s21 = scalar_lea.sflag [#allocation12], %s398_s2 }
  0x80   : > { %s1544_s26 = scalar_lea.vmem [#allocation11], %s840_s20  ;;  %p1777_p6 = scmp.ne.s32.totalorder %s1760_s12, 0 }
  0x82   : > { %1195 = dma.done.wait (%p1777_p6), %s399_s21, 128  }
  0x83   : > { %1197 = vsyncadd (%p1777_p6), %s399_s21, 4294967168  ;;  %s409_s15 = sand.u32 1, %s1216_s1   ;;  %p1778_p7 = scmp.ne.s32.totalorder %s1761_s22, 0 }
  0x84   : > { %s1551_s23 = sshll.u32 %s409_s15, 3 }
  0x85   : > { %s411_s25 = scalar_lea.vmem [#allocation13], %s1551_s23 }
  0x86   : > { %1199 = dma.done.wait (%p1778_p7), %s399_s21, 128  }
  0x87   : > { %1201 = vsyncadd (%p1778_p7), %s399_s21, 4294967168  ;;  %s1559_s24 = sshll.u32 %s1236_s19, 7  ;;  %v504_v0 = vld [vmem:[#allocation8] sm:$0x3]  ;;  %v505_v1 = vld [vmem:[%s1721_s6] sm:$0x3]  ;;  %v559_v9 = vlaneseq }
  0x88   : > { %s507_s12 = sld [smem:[#allocation4 + %s1559_s24]]  ;;  %s522_s14 = sadd.s32 1, %s1559_s24  ;;  %v556_v19 = vld [vmem:[%s411_s25] sm:$0xff]  ;;  %v557_v20 = vld [vmem:[%s1544_s26] sm:$0xff]  ;;  %v1254_v24 = vmov 0  }
  0x89   : > { %s508_s17 = sld [smem:[#allocation5 + %s1559_s24]]  ;;  %s539_s5 = sadd.s32 2, %s1559_s24  ;;  %v560_v14 = vshrl.u32 %v559_v9, 7  ;;  %v570_v26 = vcombine.high %v556_v19, %v556_v19  ;;  %v573_v27 = vcombine.high %v557_v20, %v557_v20 }
  0x8a   : > { %s509_s11 = sld [smem:[#allocation6 + %s1559_s24]]  ;;  %p483_p12 = scmp.lt.s32.totalorder %s1236_s19, 1 }
  0x8b   : > { %s510_s27 = sld [smem:[#allocation7 + %s1559_s24]]  ;;  %v561_v21 = vsub.s32 0, %v560_v14  ;;  %v565_v22 = vsub.s32 1, %v560_v14  ;;  %s596_s23 = scalar_lea.sflag [#allocation16], %s1539_s4 }
  0x8c   : > { %s523_s28 = sld [smem:[#allocation4 + %s522_s14]]  ;;  %p1789_p8 = scmp.ne.s32.totalorder %s1762_s13, 0 }
  0x8d   : > { %s524_s7 = sld [smem:[#allocation5 + %s522_s14]] }
  0x8e   : > { %v511_v2 = vstv %s507_s12  ;;  %s525_s29 = sld [smem:[#allocation6 + %s522_s14]] }
  0x8f   : > { %vm512_vm0 = vcmp.ge.s32.totalorder %v504_v0, %v511_v2  ;;  %v513_v3 = vstv %s508_s17  ;;  %s526_s16 = sld [smem:[#allocation7 + %s522_s14]] }
  0x90   : > { %vm514_vm1 = vcmp.lt.s32.totalorder %v504_v0, %v513_v3  ;;  %v516_v4 = vstv %s509_s11  ;;  %s540_s2 = sld [smem:[#allocation4 + %s539_s5]]  ;;  %s843_s11 = sshll.u32 %s1539_s4, 1 }
  0x91   : > { %vm515_vm2 = vmand %vm512_vm0, %vm514_vm1  ;;  %vm517_vm3 = vcmp.ge.s32.totalorder %v505_v1, %v516_v4  ;;  %v519_v5 = vstv %s510_s27  ;;  %s541_s21 = sld [smem:[#allocation5 + %s539_s5]] }
  0x92   : > { %vm1571_vm4 = vmand %vm515_vm2, %vm517_vm3  ;;  %vm1575_vm5 = vcmp.lt.s32.totalorder %v505_v1, %v519_v5  ;;  %v527_v8 = vstv %s523_s28  ;;  %s542_s15 = sld [smem:[#allocation6 + %s539_s5]]  ;;  %s1607_s28 = scalar_lea.vmem [#allocation14], %s840_s20 }
  0x93   : > { %vm528_vm6 = vcmp.ge.s32.totalorder %v504_v0, %v527_v8  ;;  %v529_v10 = vstv %s524_s7  ;;  %s543_s12 = sld [smem:[#allocation7 + %s539_s5]]  ;;  %vm521_vm7 = vmand %vm1571_vm4, %vm1575_vm5  ;;  %s612_s7 = sshll.u32 %s1607_s28, 4  ;;  %s1624_s7 = int_to_ptr.vmem [resolvable:$true] %s612_s7 }
  0x94   : > { %vm530_vm8 = vcmp.lt.s32.totalorder %v504_v0, %v529_v10  ;;  %v532_v11 = vstv %s525_s29  ;;  %s1586_s17 = scalar_select %p483_p12, %s1236_s19, 1 }
  0x95   : > { %vm531_vm9 = vmand %vm528_vm6, %vm530_vm8  ;;  %vm533_vm10 = vcmp.ge.s32.totalorder %v505_v1, %v532_v11  ;;  %v535_v12 = vstv %s526_s16  ;;  %s1589_s14 = sld [smem:[#allocation3 + %s1236_s19]]  ;;  %s472_s5 = scalar_lea.vmem [#allocation15], %s843_s11 }
  0x96   : > { %vm534_vm11 = vmand %vm531_vm9, %vm533_vm10  ;;  %vm536_vm12 = vcmp.lt.s32.totalorder %v505_v1, %v535_v12  ;;  %v544_v13 = vstv %s540_s2  ;;  %s844_s27 = sshll.u32 %s1586_s17, 1  ;;  %s628_s22 = sshll.u32 %s472_s5, 4  ;;  %vm587_vm9 = vcmp.lt.s32.totalorder %v559_v9, 256  ;;  %s1629_s22 = int_to_ptr.vmem [resolvable:$true] %s628_s22 }
  0x97   : > { %vm537_vm13 = vmand %vm534_vm11, %vm536_vm12  ;;  %vm545_vm14 = vcmp.ge.s32.totalorder %v504_v0, %v544_v13  ;;  %v546_v15 = vstv %s541_s21  ;;  %s489_s26 = scalar_lea.vmem %s1724_s9, %s844_s27  ;;  %s858_s20 = sshll.u32 %s1236_s19, 5 }
  0x98   : > { %vm1597_vm15 = vmor %vm521_vm7, %vm537_vm13  ;;  %vm547_vm0 = vcmp.lt.s32.totalorder %v504_v0, %v546_v15  ;;  %v549_v17 = vstv %s542_s15  ;;  %v583_v30 = vld [vmem:[%s489_s26] sm:$0x3]  ;;  %s1787_s15 = sld [smem:[#allocation35_spill]]  ;;  %s1100_s25 = scalar_lea.vmem %s1629_s22, 32 }
  0x99   : > { %vm548_vm1 = vmand %vm545_vm14, %vm547_vm0  ;;  %vm550_vm2 = vcmp.ge.s32.totalorder %v505_v1, %v549_v17  ;;  %v552_v18 = vstv %s543_s12  ;;  %s1788_s11 = sld [smem:[#allocation34_spill]]  ;;  %p1101_p2 = scmp.ne.s32.totalorder %s1629_s22, %s1100_s25 }
  0x9a   : > { %vm551_vm3 = vmand %vm548_vm1, %vm550_vm2  ;;  %vm553_vm6 = vcmp.lt.s32.totalorder %v505_v1, %v552_v18  ;;  %s1255_s26 = smov [#allocation15]  }
  0x9b   : > { %vm554_vm4 = vmand %vm551_vm3, %vm553_vm6  ;;  %p493_p11 = scmp.lt.s32.totalorder %s1589_s14, 1  ;;  %p1102_p13 = pnand %p1101_p2, %p1789_p8 }
  0x9c   : > { %vm1613_vm5 = vmor %vm1597_vm15, %vm554_vm4 }
  0x9d   : > { %v558_v25 = vsel %vm1613_vm5, 1, %v1254_v24  ;;  %s1810_s14 = smov (!%p493_p11, %s1589_s14), 1  ;;  %p1103_p0 = pneg %p1102_p13 }
  0x9e   : > { %v562_v28 = vrot.slane %v558_v25, %v561_v21  ;;  %v566_v29 = vrot.slane %v558_v25, %v565_v22  ;;  %s845_s30 = sshll.u32 %s1810_s14, 1  ;;  %s1634_s12 = scalar_lea.hbm %s1787_s15, %s858_s20 }
  0x9f   : > { %s499_s2 = scalar_lea.vmem %s1725_s10, %s845_s30  ;;  %s1642_s27 = scalar_lea.hbm %s1788_s11, %s1559_s24 }
  0xa0   : > { %vm567_vm7 = vcmp.eq.s32.totalorder %v562_v28, 1  ;;  %vm568_vm8 = vcmp.eq.s32.totalorder %v566_v29, 1  ;;  %v582_v33 = vld [vmem:[%s499_s2] sm:$0x3]  ;;  %s1104_s20 = sshll.u32 %s1255_s26, 4  ;;  %s1105_s20 = int_to_ptr.vmem [resolvable:$false] %s1104_s20 }
  0xa1   : > { %v575_v31 = vsel %vm567_vm7, %v556_v19, %v557_v20  ;;  %v576_v32 = vsel %vm568_vm8, %v570_v26, %v573_v27  ;;  %v584_v35 = vsel %vm1613_vm5, %v582_v33, %v583_v30  ;;  %s1106_s30 = scalar_lea.vmem %s1105_s20, 64  ;;  %p1107_p10 = scmp.lt.s32.totalorder %s1629_s22, %s1105_s20 }
  0xa2   : > { %v579_v34 = vcombine.low %v575_v31, %v576_v32  ;;  %589 = vst.msk [vmem:[%s472_s5] sm:$0x3] %vm587_vm9, %v584_v35  ;;  %p1108_p1 = scmp.lt.s32.totalorder %s1106_s30, %s1100_s25 }
  0xa4   : > { %581 = vst [vmem:[%s1607_s28] sm:$0xff] %v579_v34  ;;  %p1109_p4 = por %p1108_p1, %p1107_p10 }
  0xa6   : > { %p1110_p3 = pnand %p1109_p4, %p1103_p0 }
  0xa8   : > { %1113 = shalt.err (!%p1110_p3)
}
  0xa9   : > { %s1114_s24 = scalar_lea.hbm %s1634_s12, 32  ;;  %s1118_s29 = scalar_lea.hbm %s1787_s15, 64 }
  0xaa   : > { %p1115_p9 = scmp.ne.s32.totalorder %s1634_s12, %s1114_s24  ;;  %p1119_p7 = scmp.lt.s32.totalorder %s1634_s12, %s1787_s15 }
  0xab   : > { %p1120_p12 = scmp.lt.s32.totalorder %s1118_s29, %s1114_s24 }
  0xac   : > { %p1116_p5 = pnand %p1115_p9, %p1789_p8 }
  0xad   : > { %p1121_p11 = por %p1120_p12, %p1119_p7 }
  0xae   : > { %p1117_p6 = pneg %p1116_p5 }
  0xb0   : > { %p1122_p2 = pnand %p1121_p11, %p1117_p6 }
  0xb2   : > { %1125 = shalt.err (!%p1122_p2)
}
  0xb3   : > { %870 = dma.vmem_to_hbm [thread:$0]  (%p1789_p8), %s1629_s22, 32, %s1634_s12, %s596_s23  }
  0xb4   : > { %s591_s19 = scalar_lea.sflag [#allocation10], %s1539_s4  ;;  %s1126_s21 = scalar_lea.vmem %s1624_s7, 128 }
  0xb5   : > { %p1127_p13 = scmp.ne.s32.totalorder %s1624_s7, %s1126_s21  ;;  %s1256_s17 = smov [#allocation14]  }
  0xb6   : > { %s1130_s14 = sshll.u32 %s1256_s17, 4  ;;  %s1131_s14 = int_to_ptr.vmem [resolvable:$false] %s1130_s14 }
  0xb7   : > { %p1128_p0 = pnand %p1127_p13, %p1789_p8  ;;  %s1132_s25 = scalar_lea.vmem %s1131_s14, 256 }
  0xb8   : > { %p1133_p1 = scmp.lt.s32.totalorder %s1624_s7, %s1131_s14  ;;  %p1134_p4 = scmp.lt.s32.totalorder %s1132_s25, %s1126_s21 }
  0xb9   : > { %p1129_p10 = pneg %p1128_p0 }
  0xba   : > { %p1135_p3 = por %p1134_p4, %p1133_p1 }
  0xbc   : > { %p1136_p9 = pnand %p1135_p3, %p1129_p10 }
  0xbe   : > { %1139 = shalt.err (!%p1136_p9)
}
  0xbf   : > { %s1140_s22 = scalar_lea.hbm %s1642_s27, 128  ;;  %s1144_s23 = scalar_lea.hbm %s1788_s11, 256 }
  0xc0   : > { %p1141_p5 = scmp.ne.s32.totalorder %s1642_s27, %s1140_s22  ;;  %p1145_p12 = scmp.lt.s32.totalorder %s1642_s27, %s1788_s11 }
  0xc1   : > { %p1146_p11 = scmp.lt.s32.totalorder %s1144_s23, %s1140_s22 }
  0xc2   : > { %p1142_p6 = pnand %p1141_p5, %p1789_p8 }
  0xc3   : > { %p1147_p2 = por %p1146_p11, %p1145_p12 }
  0xc4   : > { %p1143_p7 = pneg %p1142_p6 }
  0xc6   : > { %p1148_p13 = pnand %p1147_p2, %p1143_p7 }
  0xc8   : > { %1151 = shalt.err (!%p1148_p13)
}
  0xc9   : > { %869 = dma.vmem_to_hbm [thread:$0]  (%p1789_p8), %s1624_s7, 128, %s1642_s27, %s591_s19  }
  0xca PF: > { %s1790_s30 = sld [smem:[#allocation28_spill]]  ;;  %s640_s24 = sand.u32 1, %s1224_s3  }
  0xcb   : > { %p1791_p0 = scmp.ne.s32.totalorder %s1763_s0, 0  ;;  %s641_s28 = scalar_lea.sflag [#allocation10], %s640_s24 }
  0xd0   : > { %p1792_p10 = scmp.ge.s32.totalorder %s1790_s30, 2 }
  0xd2   : > { %p887_p1 = pnand %p1792_p10, %p1791_p0 }
  0xd4   : > { %p888_p4 = pneg %p887_p1 }
  0xd6   : > { %1203 = dma.done.wait (%p888_p4), %s641_s28, 128  }
  0xd7   : > { %1205 = vsyncadd (%p888_p4), %s641_s28, 4294967168  ;;  %s650_s5 = scalar_lea.sflag [#allocation16], %s640_s24 }
  0xd8   : > { %1207 = dma.done.wait (%p888_p4), %s650_s5, 32  }
  0xd9   : > { %1209 = vsyncadd (%p888_p4), %s650_s5, 4294967264  ;;  %s45_s21 = sadd.s32 1, %s1790_s30   ;;  %s1793_s13 = sld [smem:[#allocation25_spill]] }
  0xda   : > { %p42_p3 = scmp.ge.s32.totalorder %s45_s21, 4   ;;  %s1794_s2 = sld [smem:[#allocation31_spill]] }
  0xdb   : > { %s1795_s7 = sld [smem:[#allocation26_spill]]  ;;  %s1799_s0 = smov %s1216_s1 }
  0xdc   : > { %s1796_s4 = sld [smem:[#allocation30_spill]]  ;;  %s1801_s3 = smov %s1228_s18 }
  0xdd   : > { %s1797_s19 = sld [smem:[#allocation27_spill]]  ;;  %44 = sbr.rel (!%p42_p3) target bundleno = 24 (0x18), region = 132 }
  0xde   : > { %s1798_s20 = sld [smem:[#allocation29_spill]] }
  0xdf   : > { %s1800_s1 = smov %s1793_s13 }
  0xe1   : > { %s1802_s18 = smov %s1795_s7 }
  0xe2   :  { %655 = vsyncpa [#allocation9], 1 }
  0xe3   :  { %657 = vsyncpa [#allocation9 + $0x1], 1 }
  0xe4   :  { %658 = vsyncpa [#allocation12], 1 }
  0xe5   :  { %660 = vsyncpa [#allocation12 + $0x1], 1 }
  0xe6   :  { %661 = vsyncpa [#allocation10], 1 }
  0xe7   :  { %663 = vsyncpa [#allocation10 + $0x1], 1 }
  0xe8   :  { %664 = vsyncpa [#allocation16], 1 }
  0xe9   :  { %666 = vsyncpa [#allocation16 + $0x1], 1 }

</bundles_post_ra>
